<compile_context>
chip_gen: v5e
topology: v5e:2x2
jax: 0.10.0
libtpu: 0.0.40
codegen_flags: <defaults>
</compile_context>

<pallas_src>
import functools

import jax
import jax.numpy as jnp
from jax.experimental import pallas as pl
from jax.experimental.pallas import tpu as pltpu


LANE = 128  # pad hidden / action dims up to a full 128-lane vreg


def qnetwork_kernel(x_ref, w1_ref, b1_ref, w2_ref, b2_ref, w3_ref, b3_ref,
                    out_ref, *, act_sub):
    # x streams in as f32; cast to bf16 on the VPU (MXU-native operand dtype).
    x = x_ref[...].astype(jnp.bfloat16)
    # fc1 + ReLU (bf16 operands, f32 accumulation / activation math)
    h1 = jnp.dot(x, w1_ref[...], preferred_element_type=jnp.float32)
    h1 = jnp.maximum(h1 + b1_ref[...], 0.0)
    # fc2 + ReLU
    h2 = jnp.dot(h1.astype(jnp.bfloat16), w2_ref[...],
                 preferred_element_type=jnp.float32)
    h2 = jnp.maximum(h2 + b2_ref[...], 0.0)
    # fc3 (no activation)
    out = jnp.dot(h2.astype(jnp.bfloat16), w3_ref[...],
                  preferred_element_type=jnp.float32)
    out = out + b3_ref[...]
    # Transposed store: actions on sublanes, batch on lanes -> (act_sub, tile_m).
    # 16x less output HBM traffic than the padded (tile_m, 128) f32 slab while
    # the lane dim (tile_m) stays a multiple of 128 on the streaming path.
    out_ref[...] = out.T[:act_sub, :]


def _round_up(n, m):
    return ((n + m - 1) // m) * m


def init_qnetwork_params(key, state_dim, action_dim, hidden=64):
    """Mimics nn.Linear default init (uniform +/- 1/sqrt(fan_in)).
    Weights stored as (in_features, out_features), f32 logical params."""
    def linear(k, fan_in, fan_out):
        kw, kb = jax.random.split(k)
        bound = 1.0 / jnp.sqrt(fan_in)
        w = jax.random.uniform(kw, (fan_in, fan_out), jnp.float32, -bound, bound)
        b = jax.random.uniform(kb, (1, fan_out), jnp.float32, -bound, bound)
        return w, b

    k1, k2, k3 = jax.random.split(key, 3)
    w1, b1 = linear(k1, state_dim, hidden)
    w2, b2 = linear(k2, hidden, hidden)
    w3, b3 = linear(k3, hidden, action_dim)
    return (w1, b1, w2, b2, w3, b3)


def pack_qnetwork_params(params):
    """Zero-pad hidden/action dims to multiples of 128 lanes; cast weights to
    bf16 (MXU-native), keep biases f32. Zero columns/rows are exact no-ops."""
    w1, b1, w2, b2, w3, b3 = params
    state_dim, hidden = w1.shape
    action_dim = w3.shape[1]
    hp = _round_up(hidden, LANE)
    op = _round_up(action_dim, LANE)

    w1p = jnp.zeros((state_dim, hp), jnp.float32).at[:, :hidden].set(w1)
    b1p = jnp.zeros((1, hp), jnp.float32).at[:, :hidden].set(b1)
    w2p = jnp.zeros((hp, hp), jnp.float32).at[:hidden, :hidden].set(w2)
    b2p = jnp.zeros((1, hp), jnp.float32).at[:, :hidden].set(b2)
    w3p = jnp.zeros((hp, op), jnp.float32).at[:hidden, :action_dim].set(w3)
    b3p = jnp.zeros((1, op), jnp.float32).at[:, :action_dim].set(b3)

    packed = (w1p.astype(jnp.bfloat16), b1p,
              w2p.astype(jnp.bfloat16), b2p,
              w3p.astype(jnp.bfloat16), b3p)
    return packed, action_dim


def _choose_tile(batch):
    """Pick the batch tile.

    Small batches (act()-style calls): one ungridded block rounded to 16 rows,
    so a batch-1 call does not pay for hundreds of padded MXU rows.
    Large batches: big tiles to amortize grid-step overhead, >=2 steps so v7x
    megacore can shard them across both TensorCores, capped at 4096 so the
    per-step VMEM footprint stays comfortable on v5e.
    """
    padded = _round_up(max(batch, 1), 16)
    if padded <= 512:
        return padded
    half = -(-padded // 2)
    return min(4096, _round_up(half, 128))


def qnetwork_forward(x, packed_params, action_dim, *, tile_m=None):
    """x: (batch, state_dim) or (state_dim,) f32. Returns Q-values
    ((batch, action_dim) or (action_dim,)) in f32."""
    w1, b1, w2, b2, w3, b3 = packed_params
    squeeze = x.ndim == 1
    if squeeze:
        x = x[None, :]
    batch, state_dim = x.shape
    hp = w1.shape[1]
    op = w3.shape[1]
    act_sub = _round_up(max(action_dim, 1), 8)
    assert act_sub <= op

    if tile_m is None:
        tile_m = _choose_tile(batch)
    padded_batch = _round_up(max(batch, 1), tile_m)
    if padded_batch != batch:
        x = jnp.pad(x, ((0, padded_batch - batch), (0, 0)))
    # NOTE: no wrapper-side bf16 cast; the kernel casts the streamed f32 tile.

    grid = (padded_batch // tile_m,)
    resident = lambda shape: pl.BlockSpec(shape, lambda i: (0, 0))

    out = pl.pallas_call(
        functools.partial(qnetwork_kernel, act_sub=act_sub),
        out_shape=jax.ShapeDtypeStruct((act_sub, padded_batch), jnp.float32),
        grid=grid,
        in_specs=[
            pl.BlockSpec((tile_m, state_dim), lambda i: (i, 0)),  # x streams
            resident((state_dim, hp)), resident((1, hp)),          # w1, b1
            resident((hp, hp)),        resident((1, hp)),          # w2, b2
            resident((hp, op)),        resident((1, op)),          # w3, b3
        ],
        # Transposed output: actions on sublanes, batch on lanes.
        out_specs=pl.BlockSpec((act_sub, tile_m), lambda i: (0, i)),
        compiler_params=pltpu.CompilerParams(
            dimension_semantics=("parallel",),
            vmem_limit_bytes=32 * 1024 * 1024),
    )(x, w1, b1, w2, b2, w3, b3)

    q = out[:action_dim, :batch].T  # (batch, action_dim) f32
    return q[0] if squeeze else q


def qnetwork_reference(x, packed_params, action_dim):
    """Pure-JAX reference with identical numerics (bf16 operands, f32 accum)."""
    w1, b1, w2, b2, w3, b3 = packed_params
    xb = x.astype(jnp.bfloat16)
    h1 = jnp.maximum(
        jnp.dot(xb, w1, preferred_element_type=jnp.float32) + b1, 0.0)
    h2 = jnp.maximum(
        jnp.dot(h1.astype(jnp.bfloat16), w2, preferred_element_type=jnp.float32) + b2,
        0.0)
    out = jnp.dot(h2.astype(jnp.bfloat16), w3,
                  preferred_element_type=jnp.float32) + b3
    return out[:, :action_dim]


if __name__ == "__main__":
    key = jax.random.PRNGKey(0)
    k_params, k_x1, k_x2 = jax.random.split(key, 3)

    state_dim, action_dim, hidden = 16, 4, 64
    params = init_qnetwork_params(k_params, state_dim, action_dim, hidden)
    packed, act_dim = pack_qnetwork_params(params)

    # Small batch (act()-style latency path: single 16-row block, grid=1).
    x_small = jax.random.normal(k_x1, (8, state_dim), jnp.float32)
    q_small = jax.block_until_ready(qnetwork_forward(x_small, packed, act_dim))
    assert q_small.shape == (8, action_dim), q_small.shape
    assert jnp.allclose(q_small, qnetwork_reference(x_small, packed, act_dim),
                        atol=1e-2, rtol=1e-2), "small-batch mismatch vs reference"

    # Single-state (vector) input path.
    q_one = jax.block_until_ready(qnetwork_forward(x_small[0], packed, act_dim))
    assert q_one.shape == (action_dim,), q_one.shape
    assert jnp.allclose(q_one, q_small[0], atol=1e-2, rtol=1e-2), "vector-input mismatch"

    # Larger batch exercising the multi-tile streaming path (grid > 1).
    x_big = jax.random.normal(k_x2, (600, state_dim), jnp.float32)
    q_big = jax.block_until_ready(qnetwork_forward(x_big, packed, act_dim))
    assert q_big.shape == (600, action_dim), q_big.shape
    assert jnp.allclose(q_big, qnetwork_reference(x_big, packed, act_dim),
                        atol=1e-2, rtol=1e-2), "large-batch mismatch vs reference"

    print("KERNEL_OK")
</pallas_src>

<mosaic_0001>
module attributes {stable_mosaic.version = 11 : i64} {
  func.func @qnetwork_kernel(%arg0: i32, %arg1: memref<16x16xf32, #tpu.memory_space<vmem>>, %arg2: memref<16x128xbf16, #tpu.memory_space<vmem>>, %arg3: memref<1x128xf32, #tpu.memory_space<vmem>>, %arg4: memref<128x128xbf16, #tpu.memory_space<vmem>>, %arg5: memref<1x128xf32, #tpu.memory_space<vmem>>, %arg6: memref<128x128xbf16, #tpu.memory_space<vmem>>, %arg7: memref<1x128xf32, #tpu.memory_space<vmem>>, %arg8: memref<8x16xf32, #tpu.memory_space<vmem>>) attributes {dimension_semantics = [#tpu.dimension_semantics<parallel>], iteration_bounds = array<i64: 1>, scalar_prefetch = 0 : i64, scratch_operands = 0 : i64, tpu.core_type = #tpu.core_type<tc>, window_params = [{transform_indices = @transform_0, window_bounds = array<i64: 16, 16>}, {pipeline_mode = #tpu.pipeline_mode<synchronous>, transform_indices = @transform_1, window_bounds = array<i64: 16, 128>}, {pipeline_mode = #tpu.pipeline_mode<synchronous>, transform_indices = @transform_2, window_bounds = array<i64: 1, 128>}, {pipeline_mode = #tpu.pipeline_mode<synchronous>, transform_indices = @transform_3, window_bounds = array<i64: 128, 128>}, {pipeline_mode = #tpu.pipeline_mode<synchronous>, transform_indices = @transform_4, window_bounds = array<i64: 1, 128>}, {pipeline_mode = #tpu.pipeline_mode<synchronous>, transform_indices = @transform_5, window_bounds = array<i64: 128, 128>}, {pipeline_mode = #tpu.pipeline_mode<synchronous>, transform_indices = @transform_6, window_bounds = array<i64: 1, 128>}, {transform_indices = @transform_7, window_bounds = array<i64: 8, 16>}]} {
    %c0 = arith.constant 0 : index
    %c0_0 = arith.constant 0 : index
    %0 = vector.load %arg1[%c0, %c0_0] : memref<16x16xf32, #tpu.memory_space<vmem>>, vector<16x16xf32>
    %1 = arith.truncf %0 : vector<16x16xf32> to vector<16x16xbf16>
    %c0_1 = arith.constant 0 : index
    %c0_2 = arith.constant 0 : index
    %2 = vector.load %arg2[%c0_1, %c0_2] : memref<16x128xbf16, #tpu.memory_space<vmem>>, vector<16x128xbf16>
    %cst = arith.constant dense<0.000000e+00> : vector<16x128xf32>
    %3 = tpu.matmul %1, %2, %cst {dimension_numbers = #tpu.dot_dimension_numbers<[1], [0], [0], [1], [0, 0, 1, 1], [], []>} : vector<16x16xbf16>, vector<16x128xbf16>, vector<16x128xf32> -> vector<16x128xf32>
    %c0_3 = arith.constant 0 : index
    %c0_4 = arith.constant 0 : index
    %4 = vector.load %arg3[%c0_3, %c0_4] : memref<1x128xf32, #tpu.memory_space<vmem>>, vector<1x128xf32>
    %5 = vector.broadcast %4 : vector<1x128xf32> to vector<16x128xf32>
    %6 = arith.addf %3, %5 : vector<16x128xf32>
    %cst_5 = arith.constant 0.000000e+00 : f32
    %7 = vector.broadcast %cst_5 : f32 to vector<16x128xf32>
    %8 = arith.maximumf %6, %7 : vector<16x128xf32>
    %9 = arith.truncf %8 : vector<16x128xf32> to vector<16x128xbf16>
    %c0_6 = arith.constant 0 : index
    %c0_7 = arith.constant 0 : index
    %10 = vector.load %arg4[%c0_6, %c0_7] : memref<128x128xbf16, #tpu.memory_space<vmem>>, vector<128x128xbf16>
    %cst_8 = arith.constant dense<0.000000e+00> : vector<16x128xf32>
    %11 = tpu.matmul %9, %10, %cst_8 {dimension_numbers = #tpu.dot_dimension_numbers<[1], [0], [0], [1], [0, 0, 1, 1], [], []>} : vector<16x128xbf16>, vector<128x128xbf16>, vector<16x128xf32> -> vector<16x128xf32>
    %c0_9 = arith.constant 0 : index
    %c0_10 = arith.constant 0 : index
    %12 = vector.load %arg5[%c0_9, %c0_10] : memref<1x128xf32, #tpu.memory_space<vmem>>, vector<1x128xf32>
    %13 = vector.broadcast %12 : vector<1x128xf32> to vector<16x128xf32>
    %14 = arith.addf %11, %13 : vector<16x128xf32>
    %cst_11 = arith.constant 0.000000e+00 : f32
    %15 = vector.broadcast %cst_11 : f32 to vector<16x128xf32>
    %16 = arith.maximumf %14, %15 : vector<16x128xf32>
    %17 = arith.truncf %16 : vector<16x128xf32> to vector<16x128xbf16>
    %c0_12 = arith.constant 0 : index
    %c0_13 = arith.constant 0 : index
    %18 = vector.load %arg6[%c0_12, %c0_13] : memref<128x128xbf16, #tpu.memory_space<vmem>>, vector<128x128xbf16>
    %cst_14 = arith.constant dense<0.000000e+00> : vector<16x128xf32>
    %19 = tpu.matmul %17, %18, %cst_14 {dimension_numbers = #tpu.dot_dimension_numbers<[1], [0], [0], [1], [0, 0, 1, 1], [], []>} : vector<16x128xbf16>, vector<128x128xbf16>, vector<16x128xf32> -> vector<16x128xf32>
    %c0_15 = arith.constant 0 : index
    %c0_16 = arith.constant 0 : index
    %20 = vector.load %arg7[%c0_15, %c0_16] : memref<1x128xf32, #tpu.memory_space<vmem>>, vector<1x128xf32>
    %21 = vector.broadcast %20 : vector<1x128xf32> to vector<16x128xf32>
    %22 = arith.addf %19, %21 : vector<16x128xf32>
    %23 = tpu.transpose %22, [1, 0] : vector<16x128xf32> -> vector<128x16xf32>
    %24 = vector.extract_strided_slice %23 {offsets = [0, 0], sizes = [8, 16], strides = [1, 1]} : vector<128x16xf32> to vector<8x16xf32>
    %c0_17 = arith.constant 0 : index
    %c0_18 = arith.constant 0 : index
    %25 = vector.load %arg8[%c0_17, %c0_18] : memref<8x16xf32, #tpu.memory_space<vmem>>, vector<8x16xf32>
    tpu.vector_store %arg8[%c0_17, %c0_18], %24 {strides = array<i32>} : memref<8x16xf32, #tpu.memory_space<vmem>>, vector<8x16xf32>,
    return
  }
  func.func @transform_0(%arg0: i32) -> (i32, i32) {
    %c0_i32 = arith.constant 0 : i32
    %c0_i32_0 = arith.constant 0 : i32
    return %arg0, %c0_i32 : i32, i32
  }
  func.func @transform_1(%arg0: i32) -> (i32, i32) {
    %c0_i32 = arith.constant 0 : i32
    %c0_i32_0 = arith.constant 0 : i32
    %c0_i32_1 = arith.constant 0 : i32
    return %c0_i32, %c0_i32_0 : i32, i32
  }
  func.func @transform_2(%arg0: i32) -> (i32, i32) {
    %c0_i32 = arith.constant 0 : i32
    %c0_i32_0 = arith.constant 0 : i32
    %c0_i32_1 = arith.constant 0 : i32
    return %c0_i32, %c0_i32_0 : i32, i32
  }
  func.func @transform_3(%arg0: i32) -> (i32, i32) {
    %c0_i32 = arith.constant 0 : i32
    %c0_i32_0 = arith.constant 0 : i32
    %c0_i32_1 = arith.constant 0 : i32
    return %c0_i32, %c0_i32_0 : i32, i32
  }
  func.func @transform_4(%arg0: i32) -> (i32, i32) {
    %c0_i32 = arith.constant 0 : i32
    %c0_i32_0 = arith.constant 0 : i32
    %c0_i32_1 = arith.constant 0 : i32
    return %c0_i32, %c0_i32_0 : i32, i32
  }
  func.func @transform_5(%arg0: i32) -> (i32, i32) {
    %c0_i32 = arith.constant 0 : i32
    %c0_i32_0 = arith.constant 0 : i32
    %c0_i32_1 = arith.constant 0 : i32
    return %c0_i32, %c0_i32_0 : i32, i32
  }
  func.func @transform_6(%arg0: i32) -> (i32, i32) {
    %c0_i32 = arith.constant 0 : i32
    %c0_i32_0 = arith.constant 0 : i32
    %c0_i32_1 = arith.constant 0 : i32
    return %c0_i32, %c0_i32_0 : i32, i32
  }
  func.func @transform_7(%arg0: i32) -> (i32, i32) {
    %c0_i32 = arith.constant 0 : i32
    %c0_i32_0 = arith.constant 0 : i32
    return %c0_i32, %arg0 : i32, i32
  }
}

</mosaic_0001>

<bundles_post_ra>
// kernel: tpu_custom_call.1
= control target key start
LH: loop header
LB: loop body
LE: loop exit
PB: predicated region body
PF: predicated region fallthrough
CT: control target
= control target key end

     0   :  { %12 = vsyncpa [#allocation3], 0  ;;  %s648_s0 = inlined_call_operand.hbm [shape: f32[16,16], index: 0, kind: input, shape index: {}]   ;;  %s649_s1 = inlined_call_operand.hbm [shape: bf16[16,128], index: 1, kind: input, shape index: {}]   ;;  %s650_s2 = inlined_call_operand.vmem [shape: f32[1,128], index: 2, kind: input, shape index: {}]   ;;  %s651_s3 = inlined_call_operand.hbm [shape: bf16[128,128], index: 3, kind: input, shape index: {}]   ;;  %s652_s4 = inlined_call_operand.vmem [shape: f32[1,128], index: 4, kind: input, shape index: {}]   ;;  %s653_s5 = inlined_call_operand.hbm [shape: bf16[128,128], index: 5, kind: input, shape index: {}]   ;;  %s654_s6 = inlined_call_operand.vmem [shape: f32[1,128], index: 6, kind: input, shape index: {}]   ;;  %s655_s7 = inlined_call_operand.hbm [shape: f32[8,16], index: 7, kind: output, shape index: {}]  }
   0x1   :  { %13 = vsyncpa [#allocation6], 0 }
   0x2   :  { %14 = vsyncpa [#allocation9], 0  ;;  %s33_s26 = sshll.u32 %s649_s1, 4  ;;  %s34_s26 = int_to_ptr.hbm [resolvable:$true] %s33_s26 }
   0x3   :  { %15 = vsyncpa [#allocation4], 0  ;;  %s573_s27 = smov [#allocation5]   ;;  %s20_s8 = sshll.u32 %s648_s0, 4  ;;  %s21_s8 = int_to_ptr.hbm [resolvable:$true] %s20_s8 }
   0x4   :  { %s35_s28 = sshll.u32 %s573_s27, 4  ;;  %s574_s9 = smov 64   ;;  %s36_s28 = int_to_ptr.vmem [resolvable:$true] %s35_s28 }
   0x5   :  { %s575_s10 = smov 4   ;;  %s576_s11 = smov [#allocation2]  }
   0x6   :  { %41 = dma.hbm_to_vmem [thread:$0]  %s34_s26, 128, %s36_s28, [#allocation6], %s574_s9, %s574_s9, %s575_s10  }
   0x7   :  { %s22_s12 = sshll.u32 %s576_s11, 4  ;;  %s577_s13 = smov 128   ;;  %s23_s12 = int_to_ptr.vmem [resolvable:$true] %s22_s12 }
   0x8   :  { %s578_s14 = smov 8   ;;  %s48_s16 = sshll.u32 %s651_s3, 4  ;;  %s49_s16 = int_to_ptr.hbm [resolvable:$true] %s48_s16 }
   0x9   :  { %28 = dma.hbm_to_vmem [thread:$0]  %s21_s8, 256, %s23_s12, [#allocation3], %s577_s13, %s577_s13, %s578_s14  }
   0xa   :  { %s579_s17 = smov [#allocation7]   ;;  %s63_s20 = sshll.u32 %s653_s5, 4  ;;  %s64_s20 = int_to_ptr.hbm [resolvable:$true] %s63_s20 }
   0xb   :  { %s50_s18 = sshll.u32 %s579_s17, 4  ;;  %s580_s21 = smov [#allocation8]   ;;  %s51_s18 = int_to_ptr.vmem [resolvable:$true] %s50_s18 }
   0xc   :  { %56 = dma.hbm_to_vmem [thread:$0]  %s49_s16, 1024, %s51_s18, [#allocation6], %s574_s9, %s574_s9, %s575_s10  }
   0xd   :  { %s65_s22 = sshll.u32 %s580_s21, 4  ;;  %s66_s22 = int_to_ptr.vmem [resolvable:$true] %s65_s22 }
   0xe   :  { %71 = dma.hbm_to_vmem [thread:$0]  %s64_s20, 1024, %s66_s22, [#allocation9], %s574_s9, %s574_s9, %s575_s10  }
   0xf   :  { %565 = dma.done.wait [#allocation3], 256  }
  0x10   :  { %566 = vsyncadd [#allocation3], 4294967040 }
  0x11   :  { %567 = dma.done.wait [#allocation6], 1152  }
  0x12   :  { %568 = vsyncadd [#allocation6], 4294966144 }
  0x13   :  { %569 = dma.done.wait [#allocation9], 1024  }
  0x14   :  { %570 = vsyncadd [#allocation9], 4294966272  ;;  %v415_v0 = vld [vmem:[#allocation5] sm:$0xff]  ;;  %v91_v1 = vld [vmem:[#allocation2] sm:$0xff]  ;;  %vm106_vm0 = vcmask 130048   ;;  %s581_s26 = smov [#allocation10]  }
  0x15   :  { %v92_v2 = vld [vmem:[#allocation2 + $0x8] sm:$0xff]  ;;  %v423_v4 = vld [vmem:[#allocation7 + $0x38] sm:$0xff]  ;;  %117 = vmatpush.bf16.msra.mxu0 %v415_v0  ;;  %v421_v6 = vld [vmem:[#allocation7 + $0x28] sm:$0xff]  ;;  %s332_s27 = sshll.u32 %s581_s26, 4  ;;  %s334_s29 = sshll.u32 %s655_s7, 4  ;;  %s333_s27 = int_to_ptr.vmem [resolvable:$true] %s332_s27  ;;  %s335_s29 = int_to_ptr.hbm [resolvable:$true] %s334_s29 }
  0x16   :  { %v93_v3 = vpack.c.bf16 %v92_v2, %v91_v1  ;;  %195 = vmatpush.bf16.msra.mxu1 %v423_v4  ;;  %v422_v5 = vld [vmem:[#allocation7 + $0x30] sm:$0xff]  ;;  %v420_v7 = vld [vmem:[#allocation7 + $0x20] sm:$0xff]  ;;  %v419_v8 = vld [vmem:[#allocation7 + $0x18] sm:$0xff] }
  0x17   :  { %v418_v9 = vld [vmem:[#allocation7 + $0x10] sm:$0xff]  ;;  %v417_v10 = vld [vmem:[#allocation7 + $0x8] sm:$0xff]  ;;  %v416_v11 = vld [vmem:[#allocation7] sm:$0xff] }
  0x18   :  { %350 = vmatmul.msk.bf16.vlgmr.msra.gmra.mxu0 %vm106_vm0, %v93_v3  ;;  %v431_v12 = vld [vmem:[#allocation8 + $0x38] sm:$0xff]  ;;  %v430_v13 = vld [vmem:[#allocation8 + $0x30] sm:$0xff]  ;;  %v429_v14 = vld [vmem:[#allocation8 + $0x28] sm:$0xff] }
  0x19   :  { %280 = vmatpush.bf16.msra.mxu2 %v431_v12  ;;  %v428_v15 = vld [vmem:[#allocation8 + $0x20] sm:$0xff]  ;;  %v442_v17 = vld [vmem:[%s650_s2] ss:$0 sm:$0xff]  ;;  %v427_v24 = vld [vmem:[#allocation8 + $0x18] sm:$0xff] }
  0x1a   :  { %196 = vmatpush.bf16.msra.mxu1 %v422_v5  ;;  %v426_v25 = vld [vmem:[#allocation8 + $0x10] sm:$0xff]  ;;  %v425_v26 = vld [vmem:[#allocation8 + $0x8] sm:$0xff]  ;;  %v424_v27 = vld [vmem:[#allocation8] sm:$0xff] }
  0x1b   :  { %v443_v29 = vld [vmem:[%s652_s4] ss:$0 sm:$0xff] }
  0x1c   :  { %v444_v36 = vld [vmem:[%s654_s6] ss:$0 sm:$0xff] }
  0x1d   :  { %281 = vmatpush.bf16.msra.mxu2 %v430_v13 }
  0x1e   :  { %197 = vmatpush.bf16.msra.mxu1 %v421_v6 }
  0x21   :  { %282 = vmatpush.bf16.msra.mxu2 %v429_v14 }
  0x22   :  { %198 = vmatpush.bf16.msra.mxu1 %v420_v7 }
  0x25   :  { %283 = vmatpush.bf16.msra.mxu2 %v428_v15 }
  0x26   :  { %199 = vmatpush.bf16.msra.mxu1 %v419_v8 }
  0x29   :  { %284 = vmatpush.bf16.msra.mxu2 %v427_v24 }
  0x2a   :  { %200 = vmatpush.bf16.msra.mxu1 %v418_v9 }
  0x2d   :  { %285 = vmatpush.bf16.msra.mxu2 %v426_v25 }
  0x2e   :  { %201 = vmatpush.bf16.msra.mxu1 %v417_v10 }
  0x31   :  { %286 = vmatpush.bf16.msra.mxu2 %v425_v26 }
  0x32   :  { %202 = vmatpush.bf16.msra.mxu1 %v416_v11 }
  0x35   :  { %287 = vmatpush.bf16.msra.mxu2 %v424_v27 }
  0x95   :  { %v119_v16 = vpop.f32.mrf.mxu0 }
  0x96   :  { %v120_v18 = vadd.f32 %v442_v17, %v119_v16 }
  0x98   :  { %v124_v21 = vmax.f32 %v120_v18, 0.0 }
  0x9d   :  { %v121_v19 = vpop.f32.mrf.mxu0 }
  0x9e   :  { %v122_v20 = vadd.f32 %v442_v17, %v121_v19 }
  0xa0   :  { %v125_v22 = vmax.f32 %v122_v20, 0.0 }
  0xa2   :  { %v126_v23 = vpack.c.bf16 %v125_v22, %v124_v21 }
  0xa4   :  { %203 = vmatmul.bf16.vlgmr.msra.gmra.mxu1 %v126_v23 }
 0x121   :  { %v204_v28 = vpop.f32.mrf.mxu1 }
 0x122   :  { %v205_v30 = vadd.f32 %v443_v29, %v204_v28 }
 0x124   :  { %v209_v33 = vmax.f32 %v205_v30, 0.0 }
 0x129   :  { %v206_v31 = vpop.f32.mrf.mxu1 }
 0x12a   :  { %v207_v32 = vadd.f32 %v443_v29, %v206_v31 }
 0x12c   :  { %v210_v34 = vmax.f32 %v207_v32, 0.0 }
 0x12e   :  { %v211_v35 = vpack.c.bf16 %v210_v34, %v209_v33 }
 0x130   :  { %288 = vmatmul.bf16.vlgmr.msra.gmra.mxu2 %v211_v35 }
 0x1b3   :  { %v289_v37 = vpop.f32.mrf.mxu2 }
 0x1b4   :  { %v290_v38 = vadd.f32 %v444_v36, %v289_v37 }
 0x1b6   :  { %294 = vxpose.xlu0.b32.start [1/2] (short) (narrow) %v290_v38, 8 }
 0x1bb   :  { %v291_v39 = vpop.f32.mrf.mxu2 }
 0x1bc   :  { %v292_v40 = vadd.f32 %v444_v36, %v291_v39 }
 0x1be   :  { %295 = vxpose.xlu0.b32.end [2/2] (short) (narrow) %v292_v40, 8 }
 0x25a   :  { %v310_v41 = vpop.trf.xlu0 }
 0x25b   :  { %326 = vst.msk [vmem:[#allocation10] sm:$0xff] %vm106_vm0, %v310_v41 }
 0x25c   :  { %337 = dma.vmem_to_hbm [thread:$0]  %s333_s27, 128, %s335_s29, [#allocation4]  }
 0x25d   :  { %571 = dma.done.wait [#allocation4], 128  }
 0x25e   :  { %572 = vsyncadd [#allocation4], 4294967168 }
 0x25f   :  { %342 = vsyncpa [#allocation3], 1 }
 0x260   :  { %343 = vsyncpa [#allocation6], 1 }
 0x261   :  { %344 = vsyncpa [#allocation9], 1 }
 0x262   :  { %345 = vsyncpa [#allocation4], 1 }

</bundles_post_ra>
